<compile_context>
chip_gen: v7x
topology: tpu7x:2x2x1
jax: 0.10.0
libtpu: 0.0.40
codegen_flags: <defaults>
</compile_context>

<pallas_src>
import jax
import jax.numpy as jnp
from jax.experimental import pallas as pl
from jax.experimental.pallas import tpu as pltpu

DIMS = [(784, 256), (256, 128), (128, 64), (64, 10)]
OUT_PAD = 128  # lane-dense padded width of the final (logits) layer


def mlp_kernel(x_ref, w1_ref, b1_ref, w2_ref, b2_ref, w3_ref, b3_ref,
               w4_ref, b4_ref, o_ref):
    # Layer 1: x arrives f32 and is cast to bf16 on-chip (avoids a separate
    # wrapper-side cast pass over HBM); bf16 x bf16 -> f32 accumulate on MXU;
    # bias + ReLU in f32 (required on v5e, cheap everywhere).
    h = jnp.dot(x_ref[...].astype(jnp.bfloat16), w1_ref[...],
                preferred_element_type=jnp.float32)
    h = jnp.maximum(h + b1_ref[...], 0.0)
    # Layer 2
    h = jnp.dot(h.astype(jnp.bfloat16), w2_ref[...],
                preferred_element_type=jnp.float32)
    h = jnp.maximum(h + b2_ref[...], 0.0)
    # Layer 3
    h = jnp.dot(h.astype(jnp.bfloat16), w3_ref[...],
                preferred_element_type=jnp.float32)
    h = jnp.maximum(h + b3_ref[...], 0.0)
    # Layer 4 (logits, lane-padded 10 -> 128, no activation); store bf16.
    h = jnp.dot(h.astype(jnp.bfloat16), w4_ref[...],
                preferred_element_type=jnp.float32)
    o_ref[...] = (h + b4_ref[...]).astype(o_ref.dtype)


def init_params(key):
    """Deterministic init matching torch.nn.Linear (uniform +-1/sqrt(fan_in))."""
    params = []
    for (fan_in, fan_out) in DIMS:
        key, kw, kb = jax.random.split(key, 3)
        bound = 1.0 / jnp.sqrt(fan_in)
        # Stored as (in, out) -- torch's (out, in) weight, pre-transposed once.
        w = jax.random.uniform(kw, (fan_in, fan_out), jnp.float32, -bound, bound)
        b = jax.random.uniform(kb, (1, fan_out), jnp.float32, -bound, bound)
        params.append((w, b))
    return params


def prepare_params(params):
    """One-time param prep (outside the hot path): bf16 weights + lane padding."""
    (w1, b1), (w2, b2), (w3, b3), (w4, b4) = params
    w1 = w1.astype(jnp.bfloat16)
    w2 = w2.astype(jnp.bfloat16)
    w3 = w3.astype(jnp.bfloat16)
    # Lane-dense final layer: zero-pad 10 -> 128 output columns.
    w4p = jnp.zeros((w4.shape[0], OUT_PAD), jnp.bfloat16).at[:, :10].set(
        w4.astype(jnp.bfloat16))
    b4p = jnp.zeros((1, OUT_PAD), jnp.float32).at[:, :10].set(b4)
    return ((w1, b1.astype(jnp.float32)),
            (w2, b2.astype(jnp.float32)),
            (w3, b3.astype(jnp.float32)),
            (w4p, b4p))


def _choose_tb(batch, batch_tile):
    """Batch tile: multiple of 16 (bf16 sublane packing), capped at batch_tile,
    and split so there are >=2 grid tiles when the batch permits (v7x megacore)."""
    b16 = ((batch + 15) // 16) * 16
    tb = min(batch_tile, b16)
    if tb >= b16 and b16 >= 32:
        # Whole batch would be one grid tile -> split in two so the second
        # TensorCore on v7x has work.  No effect on single-TC v5e/v6e.
        tb = ((b16 // 2 + 15) // 16) * 16
    return tb


def mlp_forward(x, prepped_params, *, batch_tile=1024):
    """x: (B, 784) float32; prepped_params: output of prepare_params()."""
    B = x.shape[0]
    TB = _choose_tb(B, batch_tile)
    B_pad = pl.cdiv(B, TB) * TB
    if B_pad != B:
        x = jnp.pad(x, ((0, B_pad - B), (0, 0)))

    (w1, b1), (w2, b2), (w3, b3), (w4p, b4p) = prepped_params

    grid = (B_pad // TB,)

    def tiled(i):        # batch-tiled arrays (x, out)
        return (i, 0)

    def resident(i):     # weights / biases: same block each step -> VMEM-resident
        return (0, 0)

    def resident_spec(arr):
        # Constant-index blocks never change -> single buffer is enough.
        return pl.BlockSpec(arr.shape, resident, pipeline_mode=pl.Buffered(1))

    in_specs = [
        pl.BlockSpec((TB, 784), tiled),
        resident_spec(w1), resident_spec(b1),
        resident_spec(w2), resident_spec(b2),
        resident_spec(w3), resident_spec(b3),
        resident_spec(w4p), resident_spec(b4p),
    ]
    out_specs = pl.BlockSpec((TB, OUT_PAD), tiled)

    flops = 2 * B_pad * sum(fi * fo for fi, fo in DIMS)
    bytes_accessed = (
        B_pad * 784 * 4                                        # x read (f32)
        + sum(int(w.size) * 2 for w in (w1, w2, w3, w4p))      # bf16 weights
        + sum(int(b.size) * 4 for b in (b1, b2, b3, b4p))      # f32 biases
        + B_pad * OUT_PAD * 2)                                 # bf16 logits out

    out = pl.pallas_call(
        mlp_kernel,
        out_shape=jax.ShapeDtypeStruct((B_pad, OUT_PAD), jnp.bfloat16),
        grid=grid,
        in_specs=in_specs,
        out_specs=out_specs,
        compiler_params=pltpu.CompilerParams(
            dimension_semantics=("parallel",),
            vmem_limit_bytes=32 << 20,
        ),
        cost_estimate=pl.CostEstimate(
            flops=flops, transcendentals=0, bytes_accessed=bytes_accessed),
    )(x, w1, b1, w2, b2, w3, b3, w4p, b4p)

    # Strip batch padding and logits lane padding; return f32 like the module.
    return out[:B, :10].astype(jnp.float32)


def reference_forward_f32(x, params):
    h = x
    for i, (w, b) in enumerate(params):
        h = h @ w + b
        if i < len(params) - 1:
            h = jnp.maximum(h, 0.0)
    return h


def reference_forward_bf16(x, params):
    # Mirrors the kernel's numerics: bf16 matmul operands, f32 accumulation,
    # f32 bias+ReLU, bf16 final store.
    h = x.astype(jnp.bfloat16)
    for i, (w, b) in enumerate(params):
        h = jnp.dot(h, w.astype(jnp.bfloat16),
                    preferred_element_type=jnp.float32) + b
        if i < len(params) - 1:
            h = jnp.maximum(h, 0.0).astype(jnp.bfloat16)
    return h.astype(jnp.bfloat16).astype(jnp.float32)


if __name__ == "__main__":
    key = jax.random.PRNGKey(0)
    k_params, k_x = jax.random.split(key)

    params = init_params(k_params)
    prepped = prepare_params(params)   # one-time weight prep (bf16 + padding)

    # Small batch of 32 "images" of 1x28x28 = 784 features (MNIST-like).
    # 32 rows -> two 16-row grid tiles, exercising the pipelined / megacore path.
    B = 32
    x_img = jax.random.normal(k_x, (B, 1, 28, 28), jnp.float32)
    x = x_img.reshape(-1, 784)  # same as layer.view(-1, 784)

    out = jax.block_until_ready(mlp_forward(x, prepped))
    assert out.shape == (B, 10), out.shape

    ref_bf16 = reference_forward_bf16(x, params)  # numerics-matched reference
    ref_f32 = reference_forward_f32(x, params)    # exact f32 semantics
    assert jnp.allclose(out, ref_bf16, atol=5e-3, rtol=5e-3), \
        "mismatch vs bf16-matched reference"
    assert jnp.allclose(out, ref_f32, atol=5e-2, rtol=5e-2), \
        "mismatch vs f32 reference"

    print("KERNEL_OK")
</pallas_src>

<mosaic_0001>
module attributes {stable_mosaic.version = 11 : i64} {
  func.func @mlp_kernel(%arg0: i32, %arg1: memref<16x784xf32, #tpu.memory_space<vmem>>, %arg2: memref<784x256xbf16, #tpu.memory_space<vmem>>, %arg3: memref<1x256xf32, #tpu.memory_space<vmem>>, %arg4: memref<256x128xbf16, #tpu.memory_space<vmem>>, %arg5: memref<1x128xf32, #tpu.memory_space<vmem>>, %arg6: memref<128x64xbf16, #tpu.memory_space<vmem>>, %arg7: memref<1x64xf32, #tpu.memory_space<vmem>>, %arg8: memref<64x128xbf16, #tpu.memory_space<vmem>>, %arg9: memref<1x128xf32, #tpu.memory_space<vmem>>, %arg10: memref<16x128xbf16, #tpu.memory_space<vmem>>) attributes {dimension_semantics = [#tpu.dimension_semantics<parallel>], iteration_bounds = array<i64: 2>, scalar_prefetch = 0 : i64, scratch_operands = 0 : i64, tpu.core_type = #tpu.core_type<tc>, window_params = [{transform_indices = @transform_0, window_bounds = array<i64: 16, 784>}, {pipeline_mode = #tpu.pipeline_mode<synchronous>, transform_indices = @transform_1, window_bounds = array<i64: 784, 256>}, {pipeline_mode = #tpu.pipeline_mode<synchronous>, transform_indices = @transform_2, window_bounds = array<i64: 1, 256>}, {pipeline_mode = #tpu.pipeline_mode<synchronous>, transform_indices = @transform_3, window_bounds = array<i64: 256, 128>}, {pipeline_mode = #tpu.pipeline_mode<synchronous>, transform_indices = @transform_4, window_bounds = array<i64: 1, 128>}, {pipeline_mode = #tpu.pipeline_mode<synchronous>, transform_indices = @transform_5, window_bounds = array<i64: 128, 64>}, {pipeline_mode = #tpu.pipeline_mode<synchronous>, transform_indices = @transform_6, window_bounds = array<i64: 1, 64>}, {pipeline_mode = #tpu.pipeline_mode<synchronous>, transform_indices = @transform_7, window_bounds = array<i64: 64, 128>}, {pipeline_mode = #tpu.pipeline_mode<synchronous>, transform_indices = @transform_8, window_bounds = array<i64: 1, 128>}, {transform_indices = @transform_9, window_bounds = array<i64: 16, 128>}]} {
    %c0 = arith.constant 0 : index
    %c0_0 = arith.constant 0 : index
    %0 = vector.load %arg1[%c0, %c0_0] : memref<16x784xf32, #tpu.memory_space<vmem>>, vector<16x784xf32>
    %1 = arith.truncf %0 : vector<16x784xf32> to vector<16x784xbf16>
    %c0_1 = arith.constant 0 : index
    %c0_2 = arith.constant 0 : index
    %2 = vector.load %arg2[%c0_1, %c0_2] : memref<784x256xbf16, #tpu.memory_space<vmem>>, vector<784x256xbf16>
    %cst = arith.constant dense<0.000000e+00> : vector<16x256xf32>
    %3 = tpu.matmul %1, %2, %cst {dimension_numbers = #tpu.dot_dimension_numbers<[1], [0], [0], [1], [0, 0, 1, 1], [], []>} : vector<16x784xbf16>, vector<784x256xbf16>, vector<16x256xf32> -> vector<16x256xf32>
    %c0_3 = arith.constant 0 : index
    %c0_4 = arith.constant 0 : index
    %4 = vector.load %arg3[%c0_3, %c0_4] : memref<1x256xf32, #tpu.memory_space<vmem>>, vector<1x256xf32>
    %5 = vector.broadcast %4 : vector<1x256xf32> to vector<16x256xf32>
    %6 = arith.addf %3, %5 : vector<16x256xf32>
    %cst_5 = arith.constant 0.000000e+00 : f32
    %7 = vector.broadcast %cst_5 : f32 to vector<16x256xf32>
    %8 = arith.maximumf %6, %7 : vector<16x256xf32>
    %9 = arith.truncf %8 : vector<16x256xf32> to vector<16x256xbf16>
    %c0_6 = arith.constant 0 : index
    %c0_7 = arith.constant 0 : index
    %10 = vector.load %arg4[%c0_6, %c0_7] : memref<256x128xbf16, #tpu.memory_space<vmem>>, vector<256x128xbf16>
    %cst_8 = arith.constant dense<0.000000e+00> : vector<16x128xf32>
    %11 = tpu.matmul %9, %10, %cst_8 {dimension_numbers = #tpu.dot_dimension_numbers<[1], [0], [0], [1], [0, 0, 1, 1], [], []>} : vector<16x256xbf16>, vector<256x128xbf16>, vector<16x128xf32> -> vector<16x128xf32>
    %c0_9 = arith.constant 0 : index
    %c0_10 = arith.constant 0 : index
    %12 = vector.load %arg5[%c0_9, %c0_10] : memref<1x128xf32, #tpu.memory_space<vmem>>, vector<1x128xf32>
    %13 = vector.broadcast %12 : vector<1x128xf32> to vector<16x128xf32>
    %14 = arith.addf %11, %13 : vector<16x128xf32>
    %cst_11 = arith.constant 0.000000e+00 : f32
    %15 = vector.broadcast %cst_11 : f32 to vector<16x128xf32>
    %16 = arith.maximumf %14, %15 : vector<16x128xf32>
    %17 = arith.truncf %16 : vector<16x128xf32> to vector<16x128xbf16>
    %c0_12 = arith.constant 0 : index
    %c0_13 = arith.constant 0 : index
    %18 = vector.load %arg6[%c0_12, %c0_13] : memref<128x64xbf16, #tpu.memory_space<vmem>>, vector<128x64xbf16>
    %cst_14 = arith.constant dense<0.000000e+00> : vector<16x64xf32>
    %19 = tpu.matmul %17, %18, %cst_14 {dimension_numbers = #tpu.dot_dimension_numbers<[1], [0], [0], [1], [0, 0, 1, 1], [], []>} : vector<16x128xbf16>, vector<128x64xbf16>, vector<16x64xf32> -> vector<16x64xf32>
    %c0_15 = arith.constant 0 : index
    %c0_16 = arith.constant 0 : index
    %20 = vector.load %arg7[%c0_15, %c0_16] : memref<1x64xf32, #tpu.memory_space<vmem>>, vector<1x64xf32>
    %21 = vector.broadcast %20 : vector<1x64xf32> to vector<16x64xf32>
    %22 = arith.addf %19, %21 : vector<16x64xf32>
    %cst_17 = arith.constant 0.000000e+00 : f32
    %23 = vector.broadcast %cst_17 : f32 to vector<16x64xf32>
    %24 = arith.maximumf %22, %23 : vector<16x64xf32>
    %25 = arith.truncf %24 : vector<16x64xf32> to vector<16x64xbf16>
    %c0_18 = arith.constant 0 : index
    %c0_19 = arith.constant 0 : index
    %26 = vector.load %arg8[%c0_18, %c0_19] : memref<64x128xbf16, #tpu.memory_space<vmem>>, vector<64x128xbf16>
    %cst_20 = arith.constant dense<0.000000e+00> : vector<16x128xf32>
    %27 = tpu.matmul %25, %26, %cst_20 {dimension_numbers = #tpu.dot_dimension_numbers<[1], [0], [0], [1], [0, 0, 1, 1], [], []>} : vector<16x64xbf16>, vector<64x128xbf16>, vector<16x128xf32> -> vector<16x128xf32>
    %c0_21 = arith.constant 0 : index
    %c0_22 = arith.constant 0 : index
    %28 = vector.load %arg9[%c0_21, %c0_22] : memref<1x128xf32, #tpu.memory_space<vmem>>, vector<1x128xf32>
    %29 = vector.broadcast %28 : vector<1x128xf32> to vector<16x128xf32>
    %30 = arith.addf %27, %29 : vector<16x128xf32>
    %31 = arith.truncf %30 : vector<16x128xf32> to vector<16x128xbf16>
    %c0_23 = arith.constant 0 : index
    %c0_24 = arith.constant 0 : index
    %32 = vector.load %arg10[%c0_23, %c0_24] : memref<16x128xbf16, #tpu.memory_space<vmem>>, vector<16x128xbf16>
    tpu.vector_store %arg10[%c0_23, %c0_24], %31 {strides = array<i32>} : memref<16x128xbf16, #tpu.memory_space<vmem>>, vector<16x128xbf16>,
    return
  }
  func.func @transform_0(%arg0: i32) -> (i32, i32) {
    %c0_i32 = arith.constant 0 : i32
    %c0_i32_0 = arith.constant 0 : i32
    return %arg0, %c0_i32 : i32, i32
  }
  func.func @transform_1(%arg0: i32) -> (i32, i32) {
    %c0_i32 = arith.constant 0 : i32
    %c0_i32_0 = arith.constant 0 : i32
    %c0_i32_1 = arith.constant 0 : i32
    return %c0_i32, %c0_i32_0 : i32, i32
  }
  func.func @transform_2(%arg0: i32) -> (i32, i32) {
    %c0_i32 = arith.constant 0 : i32
    %c0_i32_0 = arith.constant 0 : i32
    %c0_i32_1 = arith.constant 0 : i32
    return %c0_i32, %c0_i32_0 : i32, i32
  }
  func.func @transform_3(%arg0: i32) -> (i32, i32) {
    %c0_i32 = arith.constant 0 : i32
    %c0_i32_0 = arith.constant 0 : i32
    %c0_i32_1 = arith.constant 0 : i32
    return %c0_i32, %c0_i32_0 : i32, i32
  }
  func.func @transform_4(%arg0: i32) -> (i32, i32) {
    %c0_i32 = arith.constant 0 : i32
    %c0_i32_0 = arith.constant 0 : i32
    %c0_i32_1 = arith.constant 0 : i32
    return %c0_i32, %c0_i32_0 : i32, i32
  }
  func.func @transform_5(%arg0: i32) -> (i32, i32) {
    %c0_i32 = arith.constant 0 : i32
    %c0_i32_0 = arith.constant 0 : i32
    %c0_i32_1 = arith.constant 0 : i32
    return %c0_i32, %c0_i32_0 : i32, i32
  }
  func.func @transform_6(%arg0: i32) -> (i32, i32) {
    %c0_i32 = arith.constant 0 : i32
    %c0_i32_0 = arith.constant 0 : i32
    %c0_i32_1 = arith.constant 0 : i32
    return %c0_i32, %c0_i32_0 : i32, i32
  }
  func.func @transform_7(%arg0: i32) -> (i32, i32) {
    %c0_i32 = arith.constant 0 : i32
    %c0_i32_0 = arith.constant 0 : i32
    %c0_i32_1 = arith.constant 0 : i32
    return %c0_i32, %c0_i32_0 : i32, i32
  }
  func.func @transform_8(%arg0: i32) -> (i32, i32) {
    %c0_i32 = arith.constant 0 : i32
    %c0_i32_0 = arith.constant 0 : i32
    %c0_i32_1 = arith.constant 0 : i32
    return %c0_i32, %c0_i32_0 : i32, i32
  }
  func.func @transform_9(%arg0: i32) -> (i32, i32) {
    %c0_i32 = arith.constant 0 : i32
    %c0_i32_0 = arith.constant 0 : i32
    return %arg0, %c0_i32 : i32, i32
  }
}

</mosaic_0001>

<bundles_post_ra>
// kernel: tpu_custom_call.1
= control target key start
LH: loop header
LB: loop body
LE: loop exit
PB: predicated region body
PF: predicated region fallthrough
CT: control target
= control target key end

     0   :  { %s2717_s0 = inlined_call_operand.hbm [shape: f32[32,784], index: 0, kind: input, shape index: {}]   ;;  %s2718_s1 = inlined_call_operand.hbm [shape: bf16[784,256], index: 1, kind: input, shape index: {}]   ;;  %s2719_s2 = inlined_call_operand.vmem [shape: f32[1,256], index: 2, kind: input, shape index: {}]   ;;  %s2720_s3 = inlined_call_operand.hbm [shape: bf16[256,128], index: 3, kind: input, shape index: {}]   ;;  %s2721_s4 = inlined_call_operand.vmem [shape: f32[1,128], index: 4, kind: input, shape index: {}]   ;;  %s2722_s5 = inlined_call_operand.vmem [shape: bf16[128,64], index: 5, kind: input, shape index: {}]   ;;  %s2723_s6 = inlined_call_operand.vmem [shape: f32[1,64], index: 6, kind: input, shape index: {}]   ;;  %s2724_s7 = inlined_call_operand.vmem [shape: bf16[64,128], index: 7, kind: input, shape index: {}]   ;;  %s2725_s8 = inlined_call_operand.vmem [shape: f32[1,128], index: 8, kind: input, shape index: {}]   ;;  %s2726_s9 = inlined_call_operand.hbm [shape: bf16[32,128], index: 9, kind: output, shape index: {}]  }
   0x1   :  { %2731 = sst [smem:[#allocation13_spill]] %s2718_s1 }
   0x2   :  { %2732 = sst [smem:[#allocation14_spill]] %s2720_s3 }
   0x3   :  { %14 = vsyncpa [#allocation3], 0 }
   0x4   :  { %16 = vsyncpa [#allocation3 + $0x1], 0 }
   0x5   :  { %17 = vsyncpa [#allocation6], 0 }
   0x6   :  { %18 = vsyncpa [#allocation4], 0 }
   0x7   :  { %20 = vsyncpa [#allocation4 + $0x1], 0  ;;  %s2402_s30 = smov 0   ;;  %s2404_s10 = smov 0  }
   0x8   :  { %s2406_s11 = smov 0   ;;  %s2408_s12 = smov 0  }
   0x9 LB: > { %s2423_s13 = sadd.s32 4294967295, %s2335_s12   ;;  %s1681_s14 = sadd.s32 4294967294, %s2335_s12   ;;  %s2335_s12 = sphi %s2408_s12, %s2753_s12   ;;  %s2331_s11 = sphi %s2406_s11, %s2752_s11   ;;  %s2327_s10 = sphi %s2404_s10, %s2751_s10   ;;  %s2323_s30 = sphi %s2402_s30, %s2750_s30  }
   0xa   : > { %p46_p0 = scmp.ne.s32.totalorder %s2327_s10, %s2323_s30  ;;  %p2727_p1 = scmp.eq.s32.totalorder %s2423_s13, 0 }
   0xb   : > { %p244_p3 = scmp.eq.s32.totalorder %s1681_s14, 1  ;;  %p1682_p5 = scmp.ge.s32.totalorder %s2335_s12, 1 }
   0xc   : > { %p2432_p4 = por %p2727_p1, %p46_p0  ;;  %p251_p7 = scmp.lt.s32.totalorder %s2335_s12, 3 }
   0xd   : > { %p2437_p6 = por %p244_p3, %p46_p0  ;;  %s2337_s18 = smov [#allocation5]  }
   0xe   : > { %s2733_s15 = scalar_select %p2432_p4, 1, 0 }
   0xf   : > { %s2734_s16 = scalar_select %p2437_p6, 1, 0 }
  0x10   : > { %p2442_p8 = pnand %p1682_p5, %p251_p7  ;;  %s263_s19 = sshll.u32 %s2337_s18, 4  ;;  %s2446_s19 = int_to_ptr.vmem [resolvable:$true] %s263_s19 }
  0x11   : > { %2735 = sst [smem:[#allocation12_spill]] %s2734_s16  ;;  %s2338_s21 = smov [#allocation7]  }
  0x12   : > { %p1938_p9 = pneg %p2442_p8  ;;  %s279_s22 = sshll.u32 %s2338_s21, 4  ;;  %s2457_s22 = int_to_ptr.vmem [resolvable:$true] %s279_s22 }
  0x13   : > { %s2738_s1 = sld [smem:[#allocation13_spill]] }
  0x14   : > { %p2453_p11 = pnand %p1938_p9, %p2727_p1 }
  0x16   : > { %p2181_p13 = pneg %p2453_p11 }
  0x19   : > { %s2179_s25 = scalar_lea.hbm %s2738_s1, 12544 }
  0x1a   : > { %p2180_p12 = scmp.ne.s32.totalorder %s2738_s1, %s2179_s25  ;;  %p2186_p5 = scmp.lt.u32.totalorder %s2179_s25, %s2738_s1 }
  0x1c   : > { %p2182_p0 = pnand %p2181_p13, %p2180_p12 }
  0x1e   : > { %p2183_p3 = pneg %p2182_p0 }
  0x20   : > { %p2188_p7 = pnand %p2186_p5, %p2183_p3 }
  0x22   : > { %2191 = shalt.err (!%p2188_p7)
}
  0x23   : > { %s2192_s14 = scalar_lea.vmem %s2446_s19, 12544  ;;  %p2200_p2 = scmp.lt.s32.totalorder %s2446_s19, %s2446_s19 }
  0x24   : > { %p2193_p9 = scmp.ne.s32.totalorder %s2446_s19, %s2192_s14  ;;  %p2201_p12 = scmp.lt.s32.totalorder %s2192_s14, %s2192_s14 }
  0x26   : > { %p2195_p10 = pnand %p2193_p9, %p2181_p13  ;;  %p2202_p0 = por %p2201_p12, %p2200_p2 }
  0x28   : > { %p2196_p1 = pneg %p2195_p10 }
  0x2a   : > { %p2203_p6 = pnand %p2202_p0, %p2196_p1 }
  0x2c   : > { %2206 = shalt.err (!%p2203_p6)
}
  0x2d   : > { %s2339_s18 = smov 128   ;;  %s2340_s21 = smov 8  }
  0x2e   : > { %1941 = dma.hbm_to_vmem [thread:$0]  (!%p2453_p11), %s2738_s1, 12544, %s2446_s19, [#allocation6], %s2339_s18, %s2339_s18, %s2340_s21  }
  0x2f   : > { %s2739_s3 = sld [smem:[#allocation14_spill]] }
  0x35   : > { %s2207_s27 = scalar_lea.hbm %s2739_s3, 2048 }
  0x36   : > { %p2208_p2 = scmp.ne.s32.totalorder %s2739_s3, %s2207_s27  ;;  %p2214_p10 = scmp.lt.u32.totalorder %s2207_s27, %s2739_s3 }
  0x38   : > { %p2210_p1 = pnand %p2208_p2, %p2181_p13 }
  0x3a   : > { %p2211_p6 = pneg %p2210_p1 }
  0x3c   : > { %p2216_p3 = pnand %p2214_p10, %p2211_p6 }
  0x3e   : > { %2219 = shalt.err (!%p2216_p3)
}
  0x3f   : > { %s2220_s19 = scalar_lea.vmem %s2457_s22, 2048  ;;  %p2228_p12 = scmp.lt.s32.totalorder %s2457_s22, %s2457_s22 }
  0x40   : > { %p2221_p5 = scmp.ne.s32.totalorder %s2457_s22, %s2220_s19  ;;  %p2229_p0 = scmp.lt.s32.totalorder %s2220_s19, %s2220_s19 }
  0x42   : > { %p2223_p7 = pnand %p2221_p5, %p2181_p13  ;;  %p2230_p2 = por %p2229_p0, %p2228_p12 }
  0x44   : > { %p2224_p9 = pneg %p2223_p7 }
  0x46   : > { %p2231_p1 = pnand %p2230_p2, %p2224_p9 }
  0x48   : > { %2234 = shalt.err (!%p2231_p1)
}
  0x49   : > { %s2341_s16 = smov 64   ;;  %s2342_s18 = smov 4  }
  0x4a   : > { %1944 = dma.hbm_to_vmem [thread:$0]  (!%p2453_p11), %s2739_s3, 2048, %s2457_s22, [#allocation6], %s2341_s16, %s2341_s16, %s2342_s18  }
  0x4b   : > { %s2512_s24 = sadd.s32 1, %s2335_s12   ;;  %s33_s26 = sadd.s32 1, %s2331_s11 }
  0x4c   : > { %s30_s25 = ssub.s32 %s2335_s12, %s2512_s24  ;;  %p40_p6 = scmp.ne.s32.totalorder %s2331_s11, %s2327_s10 }
  0x4d   : > { %p31_p13 = scmp.eq.s32.totalorder %s30_s25, 0  ;;  %p41_p10 = scmp.eq.s32.totalorder %s2335_s12, 0 }
  0x4e   : > { %p2740_p5 = scmp.eq.s32.totalorder %s2423_s13, 1  ;;  %p1955_p9 = scmp.lt.s32.totalorder %s2335_s12, 2 }
  0x4f   : > { %s2521_s27 = scalar_select %p31_p13, %s2331_s11, %s33_s26  }
  0x50   : > { %p42_p3 = por %p41_p10, %p40_p6  ;;  %p2525_p7 = por %p2740_p5, %p40_p6 }
  0x51   : > { %s308_s20 = sand.u32 1, %s2331_s11   ;;  %s1924_s22 = smul.u32 1792, %s2335_s12 }
  0x52   : > { %s2741_s28 = scalar_select %p2525_p7, 1, 0 }
  0x53   : > { %s1923_s29 = smul.u32 112, %s308_s20  ;;  %p2532_p11 = pnand %p1955_p9, %p42_p3 }
  0x54   : > { %s2539_s18 = scalar_lea.hbm %s2717_s0, %s1924_s22  ;;  %s2543_s25 = scalar_lea.sflag [#allocation3], %s308_s20 }
  0x55   : > { %s312_s21 = scalar_lea.vmem [#allocation2], %s1923_s29  ;;  %s2235_s26 = scalar_lea.hbm %s2539_s18, 1792 }
  0x56   : > { %s320_s23 = sshll.u32 %s312_s21, 4  ;;  %p2236_p12 = scmp.ne.s32.totalorder %s2539_s18, %s2235_s26  ;;  %s2541_s23 = int_to_ptr.vmem [resolvable:$true] %s320_s23 }
  0x57   : > { %p2237_p0 = pneg %p2532_p11  ;;  %s2240_s16 = scalar_lea.hbm %s2717_s0, 3584 }
  0x58   : > { %p2241_p13 = scmp.lt.u32.totalorder %s2539_s18, %s2717_s0  ;;  %p2242_p6 = scmp.lt.u32.totalorder %s2240_s16, %s2235_s26 }
  0x59   : > { %p2238_p2 = pnand %p2237_p0, %p2236_p12  ;;  %p2244_p3 = scmp.lt.u32.totalorder %s2235_s26, %s2539_s18 }
  0x5a   : > { %p2243_p10 = por %p2242_p6, %p2241_p13 }
  0x5b   : > { %p2239_p1 = pneg %p2238_p2 }
  0x5c   : > { %p2245_p5 = por %p2244_p3, %p2243_p10 }
  0x5e   : > { %p2246_p9 = pnand %p2245_p5, %p2239_p1 }
  0x60   : > { %2249 = shalt.err (!%p2246_p9)
}
  0x61   : > { %s2250_s20 = scalar_lea.vmem %s2541_s23, 1792  ;;  %s2343_s29 = smov [#allocation2]  }
  0x62   : > { %p2251_p12 = scmp.ne.s32.totalorder %s2541_s23, %s2250_s20  ;;  %s2255_s21 = sshll.u32 %s2343_s29, 4  ;;  %s2256_s21 = int_to_ptr.vmem [resolvable:$false] %s2255_s21 }
  0x63   : > { %s2257_s1 = scalar_lea.vmem %s2256_s21, 3584  ;;  %p2258_p4 = scmp.lt.s32.totalorder %s2541_s23, %s2256_s21 }
  0x64   : > { %p2253_p2 = pnand %p2251_p12, %p2237_p0  ;;  %p2259_p13 = scmp.lt.s32.totalorder %s2257_s1, %s2250_s20 }
  0x66   : > { %p2254_p7 = pneg %p2253_p2  ;;  %p2260_p6 = por %p2259_p13, %p2258_p4 }
  0x68   : > { %p2261_p10 = pnand %p2260_p6, %p2254_p7 }
  0x6a   : > { %2264 = shalt.err (!%p2261_p10)
}
  0x6b   : > { %s2344_s3 = smov 896   ;;  %s2345_s26 = smov 56  }
  0x6c   : > { %1948 = dma.hbm_to_vmem [thread:$0]  (!%p2532_p11), %s2539_s18, 1792, %s2541_s23, %s2543_s25, %s2344_s3, %s2344_s3, %s2345_s26  }
  0x6d   : > { %332 = sbr.rel (%p2442_p8) target bundleno = 1159 (0x487), region = 56  ;;  %s2574_s22 = sand.u32 (!%p2442_p8), 1, %s2327_s10  }
  0x6e   : > { %s1925_s19 = smul.u32 (!%p2442_p8), 112, %s2574_s22  ;;  %s335_s16 = scalar_lea.sflag (!%p2442_p8), [#allocation3], %s2574_s22 }
  0x6f   : > { %p2743_p4 = scmp.ne.s32.totalorder (!%p2442_p8), %s2733_s15, 0 }
  0x70   : > { %s2578_s20 = scalar_lea.vmem (!%p2442_p8), [#allocation2], %s1925_s19 }
  0x74   : > { %2310 = dma.done.wait (%p2743_p4), %s335_s16, 1792  }
  0x75   : > { %2312 = vsyncadd (%p2743_p4), %s335_s16, 4294965504  ;;  %p2744_p7 = scmp.eq.s32.totalorder %s2423_s13, 0 }
  0x77   : > { %2314 = dma.done.wait (%p2744_p7), [#allocation6], 14592   ;;  %p2745_p8 = pmov %p2744_p7 }
  0x78   : > { %v2004_v0 = vld [vmem:[#allocation5 + $0x104] ss:$8 sps:$4 sm:$0xff]   ;;  %v2006_v1 = vld [vmem:[#allocation5 + $0x100] ss:$8 sps:$4 sm:$0xff]   ;;  %v2007_v2 = vld [vmem:[#allocation5 + $0x114] ss:$8 sps:$4 sm:$0xff]  }
  0x79   : > { %2316 = vsyncadd (%p2745_p8), [#allocation6], 4294952704  ;;  %1052 = vmatprep.subr.bf16.mxu0 %v2004_v0  ;;  %v2009_v3 = vld [vmem:[#allocation5 + $0x110] ss:$8 sps:$4 sm:$0xff]   ;;  %v2010_v4 = vld [vmem:[#allocation5 + $0x124] ss:$8 sps:$4 sm:$0xff]  }
  0x7a   : > { %1053 = vmatpush1.bf16.msra.mxu0 %v2006_v1  ;;  %v2012_v5 = vld [vmem:[#allocation5 + $0x120] ss:$8 sps:$4 sm:$0xff]   ;;  %v2013_v6 = vld [vmem:[#allocation5 + $0x134] ss:$8 sps:$4 sm:$0xff]   ;;  %v2015_v7 = vld [vmem:[#allocation5 + $0x130] ss:$8 sps:$4 sm:$0xff]  }
  0x7b   : > { %1054 = vmatprep.subr.bf16.mxu0 %v2007_v2  ;;  %v2016_v8 = vld [vmem:[#allocation5 + $0x144] ss:$8 sps:$4 sm:$0xff]   ;;  %v2018_v9 = vld [vmem:[#allocation5 + $0x140] ss:$8 sps:$4 sm:$0xff]   ;;  %v2019_v10 = vld [vmem:[#allocation5 + $0x154] ss:$8 sps:$4 sm:$0xff]  }
  0x7c   : > { %v2021_v11 = vld [vmem:[#allocation5 + $0x150] ss:$8 sps:$4 sm:$0xff]   ;;  %v2022_v12 = vld [vmem:[#allocation5 + $0x164] ss:$8 sps:$4 sm:$0xff]   ;;  %v2024_v16 = vld [vmem:[#allocation5 + $0x160] ss:$8 sps:$4 sm:$0xff]  }
  0x7d   : > { %v387_v13 = vld [vmem:[%s2578_s20 + $0x18] sm:$0xff]  ;;  %v394_v14 = vld [vmem:[%s2578_s20 + $0x50] sm:$0xff]  ;;  %v393_v55 = vld [vmem:[%s2578_s20 + $0x48] sm:$0xff]  ;;  %vm1005_vm0 = vcmask 130048   ;;  %vm2348_vm1 = vmmov 0   ;;  %vm1520_vm2 = vcmask 523264  }
  0x7e   : > { %1055 = vmatpush1.bf16.msra.mxu0 %v2009_v3  ;;  %v401_v15 = vpack.c.bf16 %v394_v14, %v387_v13  ;;  %v2025_v17 = vld [vmem:[#allocation5 + $0x174] ss:$8 sps:$4 sm:$0xff]   ;;  %v2058_v18 = vld [vmem:[#allocation5 + $0x4] ss:$8 sps:$4 sm:$0xff]   ;;  %v2027_v19 = vld [vmem:[#allocation5 + $0x170] ss:$8 sps:$4 sm:$0xff]  }
  0x7f   : > { %1056 = vmatprep.subr.bf16.mxu0 %v2010_v4  ;;  %v2028_v20 = vld [vmem:[#allocation5 + $0x184] ss:$8 sps:$4 sm:$0xff]   ;;  %v2063_v21 = vld [vmem:[#allocation5] ss:$8 sps:$4 sm:$0xff]   ;;  %1009 = vmatprep.subr.bf16.mxu1 %v2058_v18  ;;  %v2064_v22 = vld [vmem:[#allocation5 + $0x14] ss:$8 sps:$4 sm:$0xff]  }
  0x80   : > { %1084 = vmatprep.mubr.bf16.mxu0 %v401_v15  ;;  %1010 = vmatpush1.bf16.msra.mxu1 %v2063_v21  ;;  %v2030_v23 = vld [vmem:[#allocation5 + $0x180] ss:$8 sps:$4 sm:$0xff]   ;;  %v2069_v24 = vld [vmem:[#allocation5 + $0x10] ss:$8 sps:$4 sm:$0xff]   ;;  %v2070_v25 = vld [vmem:[#allocation5 + $0x24] ss:$8 sps:$4 sm:$0xff]  }
  0x81   : > { %1011 = vmatprep.subr.bf16.mxu1 %v2064_v22  ;;  %v2031_v26 = vld [vmem:[#allocation5 + $0x194] ss:$8 sps:$4 sm:$0xff]   ;;  %v2075_v27 = vld [vmem:[#allocation5 + $0x20] ss:$8 sps:$4 sm:$0xff]   ;;  %v2033_v29 = vld [vmem:[#allocation5 + $0x190] ss:$8 sps:$4 sm:$0xff]  }
  0x82   : > { %1057 = vmatpush1.bf16.msra.mxu0 %v2012_v5  ;;  %v2076_v28 = vld [vmem:[#allocation5 + $0x34] ss:$8 sps:$4 sm:$0xff]   ;;  %v2034_v30 = vld [vmem:[#allocation5 + $0x1a4] ss:$8 sps:$4 sm:$0xff]   ;;  %v2081_v31 = vld [vmem:[#allocation5 + $0x30] ss:$8 sps:$4 sm:$0xff]  }
  0x83   : > { %1058 = vmatprep.subr.bf16.mxu0 %v2013_v6  ;;  %v2082_v32 = vld [vmem:[#allocation5 + $0x44] ss:$8 sps:$4 sm:$0xff]   ;;  %v2036_v33 = vld [vmem:[#allocation5 + $0x1a0] ss:$8 sps:$4 sm:$0xff]   ;;  %v2037_v34 = vld [vmem:[#allocation5 + $0x1b4] ss:$8 sps:$4 sm:$0xff]  }
  0x84   : > { %1012 = vmatpush1.bf16.msra.mxu1 %v2069_v24  ;;  %v2087_v35 = vld [vmem:[#allocation5 + $0x40] ss:$8 sps:$4 sm:$0xff]   ;;  %v2088_v36 = vld [vmem:[#allocation5 + $0x54] ss:$8 sps:$4 sm:$0xff]   ;;  %v2039_v37 = vld [vmem:[#allocation5 + $0x1b0] ss:$8 sps:$4 sm:$0xff]  }
  0x85   : > { %1013 = vmatprep.subr.bf16.mxu1 %v2070_v25  ;;  %v2040_v38 = vld [vmem:[#allocation5 + $0x1c4] ss:$8 sps:$4 sm:$0xff]   ;;  %v2093_v39 = vld [vmem:[#allocation5 + $0x50] ss:$8 sps:$4 sm:$0xff]   ;;  %v2042_v41 = vld [vmem:[#allocation5 + $0x1c0] ss:$8 sps:$4 sm:$0xff]  }
  0x86   : > { %1059 = vmatpush1.bf16.msra.mxu0 %v2015_v7  ;;  %v2094_v40 = vld [vmem:[#allocation5 + $0x64] ss:$8 sps:$4 sm:$0xff]   ;;  %v2043_v42 = vld [vmem:[#allocation5 + $0x1d4] ss:$8 sps:$4 sm:$0xff]   ;;  %v2099_v43 = vld [vmem:[#allocation5 + $0x60] ss:$8 sps:$4 sm:$0xff]  }
  0x87   : > { %1060 = vmatprep.subr.bf16.mxu0 %v2016_v8  ;;  %v2100_v44 = vld [vmem:[#allocation5 + $0x74] ss:$8 sps:$4 sm:$0xff]   ;;  %v2045_v45 = vld [vmem:[#allocation5 + $0x1d0] ss:$8 sps:$4 sm:$0xff]   ;;  %v2046_v46 = vld [vmem:[#allocation5 + $0x1e4] ss:$8 sps:$4 sm:$0xff]  }
  0x88   : > { %1014 = vmatpush1.bf16.msra.mxu1 %v2075_v27  ;;  %v2105_v47 = vld [vmem:[#allocation5 + $0x70] ss:$8 sps:$4 sm:$0xff]   ;;  %v2106_v48 = vld [vmem:[#allocation5 + $0x84] ss:$8 sps:$4 sm:$0xff]   ;;  %v2048_v49 = vld [vmem:[#allocation5 + $0x1e0] ss:$8 sps:$4 sm:$0xff]  }
  0x89   : > { %1015 = vmatprep.subr.bf16.mxu1 %v2076_v28  ;;  %v2049_v50 = vld [vmem:[#allocation5 + $0x1f4] ss:$8 sps:$4 sm:$0xff]   ;;  %v2111_v51 = vld [vmem:[#allocation5 + $0x80] ss:$8 sps:$4 sm:$0xff]   ;;  %v2051_v53 = vld [vmem:[#allocation5 + $0x1f0] ss:$8 sps:$4 sm:$0xff]  }
  0x8a   : > { %1061 = vmatpush1.bf16.msra.mxu0 %v2018_v9  ;;  %v2112_v52 = vld [vmem:[#allocation5 + $0x94] ss:$8 sps:$4 sm:$0xff]   ;;  %v2054_v56 = vld [vmem:[#allocation5 + $0x204] ss:$8 sps:$4 sm:$0xff]   ;;  %v2117_v57 = vld [vmem:[#allocation5 + $0x90] ss:$8 sps:$4 sm:$0xff]  }
  0x8b   : > { %1062 = vmatprep.subr.bf16.mxu0 %v2019_v10  ;;  %v386_v54 = vld [vmem:[%s2578_s20 + $0x10] sm:$0xff]  ;;  %v389_v61 = vld [vmem:[%s2578_s20 + $0x28] sm:$0xff]  ;;  %v396_v62 = vld [vmem:[%s2578_s20 + $0x60] sm:$0xff]  ;;  %s1692_s14 = sshll.u32 %s2574_s22, 3  ;;  %s1833_s21 = sshll.u32 %s2423_s13, 7 }
  0x8c   : > { %1016 = vmatpush1.bf16.msra.mxu1 %v2081_v31  ;;  %v2052_v58 = vld [vmem:[#allocation5 + $0x200] ss:$8 sps:$4 sm:$0xff]   ;;  %v400_v59 = vpack.c.bf16 %v393_v55, %v386_v54  ;;  %v2118_v60 = vld [vmem:[#allocation5 + $0xa4] ss:$8 sps:$4 sm:$0xff]   ;;  %v2057_v63 = vld [vmem:[#allocation5 + $0x214] ss:$8 sps:$4 sm:$0xff]   ;;  %v403_v0 = vpack.c.bf16 %v396_v62, %v389_v61  ;;  %s2673_s26 = scalar_lea.hbm %s2726_s9, %s1833_s21 }
  0x8d   : > { %1017 = vmatprep.subr.bf16.mxu1 %v2082_v32  ;;  %v2123_v1 = vld [vmem:[#allocation5 + $0xa0] ss:$8 sps:$4 sm:$0xff]   ;;  %v2124_v2 = vld [vmem:[#allocation5 + $0xb4] ss:$8 sps:$4 sm:$0xff]   ;;  %v2055_v3 = vld [vmem:[#allocation5 + $0x210] ss:$8 sps:$4 sm:$0xff]  }
  0x8e   : > { %1063 = vmatpush1.bf16.msra.mxu0 %v2021_v11  ;;  %v2062_v4 = vld [vmem:[#allocation5 + $0x224] ss:$8 sps:$4 sm:$0xff]   ;;  %v2129_v7 = vld [vmem:[#allocation5 + $0xb0] ss:$8 sps:$4 sm:$0xff]   ;;  %v2060_v10 = vld [vmem:[#allocation5 + $0x220] ss:$8 sps:$4 sm:$0xff]  }
  0x8f   : > { %1064 = vmatprep.subr.bf16.mxu0 %v2022_v12  ;;  %v385_v5 = vld [vmem:[%s2578_s20 + $0x8] sm:$0xff]  ;;  %v392_v6 = vld [vmem:[%s2578_s20 + $0x40] sm:$0xff]  ;;  %v2346_v61 = vmov 0   ;;  %v390_v62 = vld [vmem:[%s2578_s20 + $0x30] sm:$0xff]  ;;  %s380_s25 = scalar_lea.vmem [#allocation8], %s1692_s14  ;;  %s1576_s19 = scalar_lea.sflag [#allocation4], %s2574_s22 }
  0x90   : > { %1018 = vmatpush1.bf16.msra.mxu1 %v2087_v35  ;;  %v399_v8 = vpack.c.bf16 %v392_v6, %v385_v5  ;;  %v2130_v9 = vld [vmem:[#allocation5 + $0xc4] ss:$8 sps:$4 sm:$0xff]   ;;  %v2068_v11 = vld [vmem:[#allocation5 + $0x234] ss:$8 sps:$4 sm:$0xff]   ;;  %v2135_v12 = vld [vmem:[#allocation5 + $0xc0] ss:$8 sps:$4 sm:$0xff]  }
  0x91   : > { %1019 = vmatprep.subr.bf16.mxu1 %v2088_v36  ;;  %v2136_v13 = vld [vmem:[#allocation5 + $0xd4] ss:$8 sps:$4 sm:$0xff]   ;;  %v2066_v14 = vld [vmem:[#allocation5 + $0x230] ss:$8 sps:$4 sm:$0xff]   ;;  %v2074_v15 = vld [vmem:[#allocation5 + $0x244] ss:$8 sps:$4 sm:$0xff]  }
  0x92   : > { %1065 = vmatpush1.bf16.msra.mxu0 %v2024_v16  ;;  %1041 = vmatprep.mubr.bf16.mxu1 %v399_v8  ;;  %v2072_v16 = vld [vmem:[#allocation5 + $0x240] ss:$8 sps:$4 sm:$0xff]   ;;  %v2080_v18 = vld [vmem:[#allocation5 + $0x254] ss:$8 sps:$4 sm:$0xff]   ;;  %v2078_v22 = vld [vmem:[#allocation5 + $0x250] ss:$8 sps:$4 sm:$0xff]  }
  0x93   : > { %1066 = vmatprep.subr.bf16.mxu0 %v2025_v17  ;;  %v2141_v17 = vld [vmem:[#allocation5 + $0xd0] ss:$8 sps:$4 sm:$0xff]   ;;  %v2148_v21 = vld [vmem:[#allocation5 + $0xf4] ss:$8 sps:$4 sm:$0xff]   ;;  %v2084_v28 = vld [vmem:[#allocation5 + $0x260] ss:$8 sps:$4 sm:$0xff]  }
  0x94   : > { %1020 = vmatpush1.bf16.msra.mxu1 %v2093_v39  ;;  %v2150_v24 = vld [vmem:[#allocation5 + $0xf0] ss:$8 sps:$4 sm:$0xff]   ;;  %v2155_v36 = vld [vmem:[#allocation7 + $0x50] sm:$0xff]   ;;  %v2140_v54 = vld [vmem:[#allocation5 + $0x2f4] ss:$8 sps:$4 sm:$0xff]   ;;  %v2347_v8 = vmov 0.0  }
  0x95   : > { %1021 = vmatprep.subr.bf16.mxu1 %v2094_v40  ;;  %v384_v25 = vld [vmem:[%s2578_s20] sm:$0xff]  ;;  %v2153_v32 = vld [vmem:[#allocation7 + $0x48] sm:$0xff]   ;;  %v2157_v40 = vld [vmem:[#allocation7 + $0x58] sm:$0xff]   ;;  %s1589_s29 = sshll.u32 %s380_s25, 4  ;;  %p2746_p0 = scmp.ne.s32.totalorder %s2741_s28, 0  ;;  %s2668_s29 = int_to_ptr.vmem [resolvable:$true] %s1589_s29 }
  0x96   : > { %1067 = vmatpush1.bf16.msra.mxu0 %v2027_v19  ;;  %v2142_v19 = vld [vmem:[#allocation5 + $0xe4] ss:$8 sps:$4 sm:$0xff]   ;;  %v2151_v27 = vld [vmem:[#allocation7 + $0x40] sm:$0xff]   ;;  %v2154_v35 = vld [vmem:[#allocation7 + $0x8] sm:$0xff]   ;;  %s2265_s16 = scalar_lea.vmem %s2668_s29, 128  ;;  %s2349_s13 = smov [#allocation8]  }
  0x97   : > { %1068 = vmatprep.subr.bf16.mxu0 %v2028_v20  ;;  %v2147_v20 = vld [vmem:[#allocation5 + $0xe0] ss:$8 sps:$4 sm:$0xff]   ;;  %v2138_v55 = vld [vmem:[#allocation5 + $0x2f0] ss:$8 sps:$4 sm:$0xff]   ;;  %p2266_p11 = scmp.ne.s32.totalorder %s2668_s29, %s2265_s16 }
  0x98   : > { %1022 = vmatpush1.bf16.msra.mxu1 %v2099_v43  ;;  %v2156_v39 = vld [vmem:[#allocation7 + $0x10] sm:$0xff]   ;;  %v2158_v43 = vld [vmem:[#allocation7 + $0x18] sm:$0xff]  }
  0x99   : > { %1023 = vmatprep.subr.bf16.mxu1 %v2100_v44  ;;  %v2159_v44 = vld [vmem:[#allocation7 + $0x60] sm:$0xff]   ;;  %v2164_v5 = vld [vmem:[#allocation7 + $0x30] sm:$0xff]   ;;  %v2165_v6 = vld [vmem:[#allocation7 + $0x78] sm:$0xff]   ;;  %p2267_p1 = pnand %p2266_p11, %p2746_p0 }
  0x9a   : > { %1069 = vmatpush1.bf16.msra.mxu0 %v2030_v23  ;;  %v2086_v23 = vld [vmem:[#allocation5 + $0x264] ss:$8 sps:$4 sm:$0xff]  }
  0x9b   : > { %1070 = vmatprep.subr.bf16.mxu0 %v2031_v26  ;;  %v391_v26 = vld [vmem:[%s2578_s20 + $0x38] sm:$0xff]  ;;  %p2268_p3 = pneg %p2267_p1 }
  0x9c   : > { %1024 = vmatpush1.bf16.msra.mxu1 %v2105_v47  ;;  %v398_v31 = vpack.c.bf16 %v391_v26, %v384_v25  ;;  %v2114_v47 = vld [vmem:[#allocation5 + $0x2b0] ss:$8 sps:$4 sm:$0xff]  }
  0x9d   : > { %1025 = vmatprep.subr.bf16.mxu1 %v2106_v48  ;;  %v2122_v48 = vld [vmem:[#allocation5 + $0x2c4] ss:$8 sps:$4 sm:$0xff]  }
  0x9e   : > { %1071 = vmatpush1.bf16.msra.mxu0 %v2033_v29  ;;  %v2092_v29 = vld [vmem:[#allocation5 + $0x274] ss:$8 sps:$4 sm:$0xff]  }
  0x9f   : > { %1072 = vmatprep.subr.bf16.mxu0 %v2034_v30  ;;  %v2152_v30 = vld [vmem:[#allocation7] sm:$0xff]  }
  0xa0   : > { %1026 = vmatpush1.bf16.msra.mxu1 %v2111_v51  ;;  %v2126_v51 = vld [vmem:[#allocation5 + $0x2d0] ss:$8 sps:$4 sm:$0xff]  }
  0xa1   : > { %1027 = vmatprep.subr.bf16.mxu1 %v2112_v52  ;;  %v2134_v52 = vld [vmem:[#allocation5 + $0x2e4] ss:$8 sps:$4 sm:$0xff]  }
  0xa2   : > { %1073 = vmatpush1.bf16.msra.mxu0 %v2036_v33  ;;  %v2090_v33 = vld [vmem:[#allocation5 + $0x270] ss:$8 sps:$4 sm:$0xff]  }
  0xa3   : > { %1074 = vmatprep.subr.bf16.mxu0 %v2037_v34  ;;  %v2098_v34 = vld [vmem:[#allocation5 + $0x284] ss:$8 sps:$4 sm:$0xff]  }
  0xa4   : > { %1028 = vmatpush1.bf16.msra.mxu1 %v2117_v57  ;;  %v395_v57 = vld [vmem:[%s2578_s20 + $0x58] sm:$0xff] }
  0xa5   : > { %1029 = vmatprep.subr.bf16.mxu1 %v2118_v60  ;;  %v2144_v60 = vld [vmem:[#allocation5 + $0x300] ss:$8 sps:$4 sm:$0xff]  }
  0xa6   : > { %1075 = vmatpush1.bf16.msra.mxu0 %v2039_v37  ;;  %v2096_v37 = vld [vmem:[#allocation5 + $0x280] ss:$8 sps:$4 sm:$0xff]  }
  0xa7   : > { %1076 = vmatprep.subr.bf16.mxu0 %v2040_v38  ;;  %v2104_v38 = vld [vmem:[#allocation5 + $0x294] ss:$8 sps:$4 sm:$0xff]  }
  0xa8   : > { %1030 = vmatpush1.bf16.msra.mxu1 %v2123_v1  ;;  %v2160_v1 = vld [vmem:[#allocation7 + $0x20] sm:$0xff]  }
  0xa9   : > { %1031 = vmatprep.subr.bf16.mxu1 %v2124_v2  ;;  %v2161_v2 = vld [vmem:[#allocation7 + $0x68] sm:$0xff]  }
  0xaa   : > { %1077 = vmatpush1.bf16.msra.mxu0 %v2042_v41  ;;  %v2102_v41 = vld [vmem:[#allocation5 + $0x290] ss:$8 sps:$4 sm:$0xff]  }
  0xab   : > { %1078 = vmatprep.subr.bf16.mxu0 %v2043_v42  ;;  %v2110_v42 = vld [vmem:[#allocation5 + $0x2a4] ss:$8 sps:$4 sm:$0xff]  }
  0xac   : > { %1032 = vmatpush1.bf16.msra.mxu1 %v2129_v7  ;;  %v2166_v7 = vld [vmem:[#allocation7 + $0x38] sm:$0xff]  }
  0xad   : > { %1033 = vmatprep.subr.bf16.mxu1 %v2130_v9 }
  0xae   : > { %1079 = vmatpush1.bf16.msra.mxu0 %v2045_v45  ;;  %v2108_v45 = vld [vmem:[#allocation5 + $0x2a0] ss:$8 sps:$4 sm:$0xff]  }
  0xaf   : > { %1080 = vmatprep.subr.bf16.mxu0 %v2046_v46  ;;  %v2116_v46 = vld [vmem:[#allocation5 + $0x2b4] ss:$8 sps:$4 sm:$0xff]  }
  0xb0   : > { %1034 = vmatpush1.bf16.msra.mxu1 %v2135_v12 }
  0xb1   : > { %1035 = vmatprep.subr.bf16.mxu1 %v2136_v13  ;;  %v505_v13 = vlaneseq }
  0xb2   : > { %1081 = vmatpush1.bf16.msra.mxu0 %v2048_v49  ;;  %v2120_v49 = vld [vmem:[#allocation5 + $0x2c0] ss:$8 sps:$4 sm:$0xff]  }
  0xb3   : > { %1082 = vmatprep.subr.bf16.mxu0 %v2049_v50  ;;  %v2128_v50 = vld [vmem:[#allocation5 + $0x2d4] ss:$8 sps:$4 sm:$0xff]  }
  0xb4   : > { %1036 = vmatpush1.bf16.msra.mxu1 %v2141_v17 }
  0xb5   : > { %1037 = vmatprep.subr.bf16.mxu1 %v2142_v19 }
  0xb6   : > { %1083 = vmatpush1.bf16.msra.mxu0 %v2051_v53  ;;  %v2132_v53 = vld [vmem:[#allocation5 + $0x2e0] ss:$8 sps:$4 sm:$0xff]  }
  0xb7   : > { %1095 = vmatprep.subr.bf16.mxu0 %v2054_v56  ;;  %v388_v56 = vld [vmem:[%s2578_s20 + $0x20] sm:$0xff] }
  0xb8   : > { %1038 = vmatpush1.bf16.msra.mxu1 %v2147_v20 }
  0xb9   : > { %1085 = vmatmul.mubr.bf16.vlgmr.msra.gmra.mrb[0].mxu0 %v400_v59  ;;  %1039 = vmatprep.subr.bf16.mxu1 %v2148_v21  ;;  %v402_v59 = vpack.c.bf16 %v395_v57, %v388_v56  ;;  %v2175_v57 = vld [vmem:[%s2724_s7] sm:$0xff]  }
  0xba   : > { %1096 = vmatpush1.bf16.msra.mxu0 %v2052_v58  ;;  %1127 = vmatprep.mubr.bf16.mxu0 %v403_v0  ;;  %v2146_v58 = vld [vmem:[#allocation5 + $0x304] ss:$8 sps:$4 sm:$0xff]  }
  0xbb   : > { %1097 = vmatprep.subr.bf16.mxu0 %v2057_v63  ;;  %v397_v63 = vld [vmem:[%s2578_s20 + $0x68] sm:$0xff]  ;;  %s2269_s20 = sshll.u32 %s2349_s13, 4  ;;  %s2270_s20 = int_to_ptr.vmem [resolvable:$false] %s2269_s20 }
  0xbc   : > { %1040 = vmatpush1.bf16.msra.mxu1 %v2150_v24  ;;  %v404_v0 = vpack.c.bf16 %v397_v63, %v390_v62  ;;  %v1809_v62 = vld [vmem:[%s2723_s6] ss:$0 sm:$0xff]  ;;  %s2271_s15 = scalar_lea.vmem %s2270_s20, 256  ;;  %p2272_p5 = scmp.lt.s32.totalorder %s2668_s29, %s2270_s20 }
  0xbd   : > { %1839 = vmatprep.subr.bf16.mxu1 %v2151_v27  ;;  %p2273_p9 = scmp.lt.s32.totalorder %s2271_s15, %s2265_s16 }
  0xbe   : > { %1098 = vmatpush1.bf16.msra.mxu0 %v2055_v3  ;;  %v2162_v3 = vld [vmem:[#allocation7 + $0x28] sm:$0xff]  }
  0xbf   : > { %1099 = vmatprep.subr.bf16.mxu0 %v2062_v4  ;;  %1042 = vmatmul.mubr.bf16.vlgmr.msra.gmra.mrb[0].mxu1 %v398_v31  ;;  %v2163_v4 = vld [vmem:[#allocation7 + $0x70] sm:$0xff]   ;;  %p2274_p12 = por %p2273_p9, %p2272_p5 }
  0xc0   : > { %1840 = vmatpush3.bf16.msra.mxu1 %v2152_v30 }
  0xc1   : > { %1841 = vmatprep.subr.bf16.mxu1 %v2153_v32  ;;  %p2275_p2 = pnand %p2274_p12, %p2268_p3 }
  0xc2   : > { %1100 = vmatpush1.bf16.msra.mxu0 %v2060_v10 }
  0xc3   : > { %1101 = vmatprep.subr.bf16.mxu0 %v2068_v11 }
  0xc4   : > { %1842 = vmatpush3.bf16.msra.mxu1 %v2154_v35 }
  0xc5   : > { %1843 = vmatprep.subr.bf16.mxu1 %v2155_v36 }
  0xc6   : > { %1102 = vmatpush1.bf16.msra.mxu0 %v2066_v14  ;;  %v506_v14 = vshrl.u32 %v505_v13, 7 }
  0xc7   : > { %1103 = vmatprep.subr.bf16.mxu0 %v2074_v15 }
  0xc8   : > { %1844 = vmatpush3.bf16.msra.mxu1 %v2156_v39  ;;  %v507_v15 = vsub.s32 0, %v506_v14  ;;  %v511_v17 = vsub.s32 1, %v506_v14  ;;  %v2168_v39 = vld [vmem:[%s2722_s5 + $0x8] sm:$0xff]  }
  0xc9   : > { %1845 = vmatprep.subr.bf16.mxu1 %v2157_v40  ;;  %v2169_v40 = vld [vmem:[%s2722_s5 + $0x10] sm:$0xff]  }
  0xca   : > { %1104 = vmatpush1.bf16.msra.mxu0 %v2072_v16  ;;  %v503_v16 = vld [vmem:[%s2719_s2] sm:$0x3] }
  0xcb   : > { %1105 = vmatprep.subr.bf16.mxu0 %v2080_v18  ;;  %v508_v18 = vrot.slane %v503_v16, %v507_v15  ;;  %v512_v19 = vrot.slane %v503_v16, %v511_v17 }
  0xcc   : > { %1846 = vmatpush3.bf16.msra.mxu1 %v2158_v43  ;;  %v2172_v43 = vld [vmem:[%s2722_s5 + $0x28] sm:$0xff]  }
  0xcd   : > { %1847 = vmatprep.subr.bf16.mxu1 %v2159_v44  ;;  %v2173_v44 = vld [vmem:[%s2722_s5 + $0x30] sm:$0xff]  }
  0xce   : > { %1106 = vmatpush1.bf16.msra.mxu0 %v2078_v22 }
  0xcf   : > { %1107 = vmatprep.subr.bf16.mxu0 %v2086_v23 }
  0xd0   : > { %1848 = vmatpush3.bf16.msra.mxu1 %v2160_v1 }
  0xd1   : > { %1849 = vmatprep.subr.bf16.mxu1 %v2161_v2 }
  0xd2   : > { %1108 = vmatpush1.bf16.msra.mxu0 %v2084_v28 }
  0xd3   : > { %1109 = vmatprep.subr.bf16.mxu0 %v2092_v29 }
  0xd4   : > { %1850 = vmatpush3.bf16.msra.mxu1 %v2162_v3 }
  0xd5   : > { %1851 = vmatprep.subr.bf16.mxu1 %v2163_v4 }
  0xd6   : > { %1110 = vmatpush1.bf16.msra.mxu0 %v2090_v33 }
  0xd7   : > { %1111 = vmatprep.subr.bf16.mxu0 %v2098_v34 }
  0xd8   : > { %1852 = vmatpush3.bf16.msra.mxu1 %v2164_v5 }
  0xd9   : > { %1853 = vmatprep.subr.bf16.mxu1 %v2165_v6 }
  0xda   : > { %1112 = vmatpush1.bf16.msra.mxu0 %v2096_v37 }
  0xdb   : > { %1113 = vmatprep.subr.bf16.mxu0 %v2104_v38  ;;  %v2167_v38 = vld [vmem:[%s2722_s5] sm:$0xff]  }
  0xdc   : > { %1854 = vmatpush3.bf16.msra.mxu1 %v2166_v7 }
  0xdd   : > { %1875 = vmatprep.subr.bf16.mxu1 %v2347_v8 }
  0xde   : > { %1114 = vmatpush1.bf16.msra.mxu0 %v2102_v41  ;;  %v2170_v41 = vld [vmem:[%s2722_s5 + $0x18] sm:$0xff]  }
  0xdf   : > { %1115 = vmatprep.subr.bf16.mxu0 %v2110_v42  ;;  %v2171_v42 = vld [vmem:[%s2722_s5 + $0x20] sm:$0xff]  }
  0xe2   : > { %1116 = vmatpush1.bf16.msra.mxu0 %v2108_v45  ;;  %v2174_v45 = vld [vmem:[%s2722_s5 + $0x38] sm:$0xff]  }
  0xe3   : > { %1117 = vmatprep.subr.bf16.mxu0 %v2116_v46 }
  0xe6   : > { %1118 = vmatpush1.bf16.msra.mxu0 %v2114_v47  ;;  %v1792_v47 = vld [vmem:[%s2721_s4] ss:$0 sm:$0xff] }
  0xe7   : > { %1119 = vmatprep.subr.bf16.mxu0 %v2122_v48 }
  0xea   : > { %1120 = vmatpush1.bf16.msra.mxu0 %v2120_v49 }
  0xeb   : > { %1121 = vmatprep.subr.bf16.mxu0 %v2128_v50 }
  0xee   : > { %1122 = vmatpush1.bf16.msra.mxu0 %v2126_v51 }
  0xef   : > { %1123 = vmatprep.subr.bf16.mxu0 %v2134_v52 }
  0xf2   : > { %1124 = vmatpush1.bf16.msra.mxu0 %v2132_v53 }
  0xf3   : > { %1125 = vmatprep.subr.bf16.mxu0 %v2140_v54 }
  0xf6   : > { %1126 = vmatpush1.bf16.msra.mxu0 %v2138_v55 }
  0xf7   : > { %1138 = vmatprep.subr.bf16.mxu0 %v2146_v58 }
  0xf9   : > { %1128 = vmatmul.mubr.bf16.vlgmr.msra.gmra.mrb[0].mxu0 %v402_v59  ;;  %v2176_v59 = vld [vmem:[%s2724_s7 + $0x8] sm:$0xff]  }
  0xfa   : > { %1139 = vmatpush1.bf16.msra.mxu0 %v2144_v60  ;;  %1170 = vmatprep.mubr.bf16.mxu0 %v2346_v61  ;;  %v2177_v60 = vld [vmem:[%s2724_s7 + $0x10] sm:$0xff]   ;;  %v2178_v61 = vld [vmem:[%s2724_s7 + $0x18] sm:$0xff]  }
 0x105   : > { %1791 = vmatmul.mubr.msk.bf16.vlgmr.msra.gmra.mrb[0].mxu0 %vm1005_vm0, %v404_v0 }
 0x192   : > { %v1043_v9 = vpop.f32.mrb[0].mxu1 }
 0x193   : > { %v1045_v10 = vpop.f32.mrb[1].mxu1  ;;  %v1044_v20 = vadd.f32 %v1043_v9, %v508_v18 }
 0x194   : > { %v1047_v11 = vpop.f32.mrb[2].mxu1  ;;  %v1046_v21 = vadd.f32 %v1045_v10, %v512_v19 }
 0x195   : > { %v1049_v12 = vpop.f32.mrb[3].mxu1  ;;  %v1048_v23 = vadd.f32 %v1047_v11, %v508_v18 }
 0x196   : > { %v1050_v26 = vadd.f32 %v1049_v12, %v512_v19 }
 0x1d8   : > { %v1172_v22 = vpop.f32.mrb[0].mxu0 }
 0x1d9   : > { %v1908_v24 = vadd.f32 %v1172_v22, %v1044_v20  ;;  %v1174_v25 = vpop.f32.mrb[1].mxu0 }
 0x1da   : > { %v1910_v27 = vadd.f32 %v1174_v25, %v1046_v21  ;;  %v1176_v28 = vpop.f32.mrb[2].mxu0 }
 0x1db   : > { %v1912_v29 = vadd.f32 %v1176_v28, %v1048_v23  ;;  %v1178_v30 = vpop.f32.mrb[3].mxu0  ;;  %v1181_v32 = vmax.f32 %v1908_v24, 0.0 }
 0x1dc   : > { %v1914_v31 = vadd.f32 %v1178_v30, %v1050_v26  ;;  %v1182_v34 = vmax.f32 %v1910_v27, 0.0 }
 0x1dd   : > { %v1183_v33 = vmax.f32 %v1912_v29, 0.0 }
 0x1de   : > { %v1184_v35 = vmax.f32 %v1914_v31, 0.0 }
 0x1df   : > { %v1185_v36 = vpack.c.bf16 %v1183_v33, %v1181_v32 }
 0x1e0   : > { %v1186_v37 = vpack.c.bf16 %v1184_v35, %v1182_v34 }
 0x1e2   : > { %1354 = vmatprep.mubr.bf16.mxu1 %v1186_v37 }
 0x1e3   : > { %1355 = vmatmul.mubr.bf16.vlgmr.msra.gmra.mrb[4].mxu1 %v1185_v36 }
 0x1e4   : > { %1876 = vmatpush3.bf16.msra.mxu1 %v2167_v38  ;;  %1891 = vmatprep.mubr.msk.bf16.mxu1 %vm2348_vm1, %v2347_v8 }
 0x1e5   : > { %1877 = vmatprep.subr.bf16.mxu1 %v2347_v8 }
 0x1e8   : > { %1878 = vmatpush3.bf16.msra.mxu1 %v2168_v39 }
 0x1e9   : > { %1879 = vmatprep.subr.bf16.mxu1 %v2347_v8 }
 0x1ec   : > { %1880 = vmatpush3.bf16.msra.mxu1 %v2169_v40 }
 0x1ed   : > { %1881 = vmatprep.subr.bf16.mxu1 %v2347_v8 }
 0x1f0   : > { %1882 = vmatpush3.bf16.msra.mxu1 %v2170_v41 }
 0x1f1   : > { %1883 = vmatprep.subr.bf16.mxu1 %v2347_v8 }
 0x1f4   : > { %1884 = vmatpush3.bf16.msra.mxu1 %v2171_v42 }
 0x1f5   : > { %1885 = vmatprep.subr.bf16.mxu1 %v2347_v8 }
 0x1f8   : > { %1886 = vmatpush3.bf16.msra.mxu1 %v2172_v43 }
 0x1f9   : > { %1887 = vmatprep.subr.bf16.mxu1 %v2347_v8 }
 0x1fc   : > { %1888 = vmatpush3.bf16.msra.mxu1 %v2173_v44 }
 0x1fd   : > { %1889 = vmatprep.subr.bf16.mxu1 %v2347_v8 }
 0x200   : > { %1890 = vmatpush3.bf16.msra.mxu1 %v2174_v45 }
 0x201   : > { %1895 = vmatprep.subr.bf16.mxu1 %v2347_v8 }
 0x2b6   : > { %v1855_v46 = vpop.f32.mrb[4].mxu1 }
 0x2b7   : > { %v1856_v48 = vpop.f32.mrb[5].mxu1 }
 0x2b8   : > { %v1857_v49 = vadd.f32 %v1856_v48, %v1855_v46  ;;  %v1858_v50 = vpop.f32.mrb[6].mxu1 }
 0x2b9   : > { %v1859_v51 = vpop.f32.mrb[7].mxu1 }
 0x2ba   : > { %v1357_v52 = vadd.f32 %v1857_v49, %v1792_v47  ;;  %v1860_v53 = vadd.f32 %v1859_v51, %v1858_v50 }
 0x2bc   : > { %v1360_v54 = vadd.f32 %v1860_v53, %v1792_v47  ;;  %v1363_v55 = vmax.f32 %v1357_v52, 0.0 }
 0x2be   : > { %v1364_v56 = vmax.f32 %v1360_v54, 0.0 }
 0x2c0   : > { %v1365_v58 = vpack.c.bf16 %v1364_v56, %v1363_v55 }
 0x2c2   : > { %1892 = vmatmul.mubr.bf16.vlgmr.msra.gmra.mrb[8].mxu1 %v1365_v58 }
 0x2c3   : > { %1896 = vmatpush3.bf16.msra.mxu1 %v2175_v57  ;;  %1903 = vmatprep.mubr.msk.bf16.mxu1 %vm2348_vm1, %v2347_v8 }
 0x2c4   : > { %1897 = vmatprep.subr.bf16.mxu1 %v2347_v8 }
 0x2c7   : > { %1898 = vmatpush3.bf16.msra.mxu1 %v2176_v59 }
 0x2c8   : > { %1899 = vmatprep.subr.bf16.mxu1 %v2347_v8 }
 0x2cb   : > { %1900 = vmatpush3.bf16.msra.mxu1 %v2177_v60 }
 0x2cc   : > { %1901 = vmatprep.subr.bf16.mxu1 %v2347_v8  ;;  %v1818_v8 = vld [vmem:[%s2725_s8] ss:$0 sm:$0xff] }
 0x2cf   : > { %1902 = vmatpush3.bf16.msra.mxu1 %v2178_v61 }
 0x395   : > { %v1471_v63 = vpop.f32.mrb[8].mxu1 }
 0x396   : > { %v1472_v0 = vadd.f32 %v1809_v62, %v1471_v63  ;;  %v1893_v1 = vpop.f32.mrb[9].mxu1 }
 0x397   : > { %v1474_v2 = vpop.f32.mrb[10].mxu1 }
 0x398   : > { %v1475_v3 = vadd.f32 %v1809_v62, %v1474_v2  ;;  %v1894_v4 = vpop.f32.mrb[11].mxu1  ;;  %v1478_v5 = vmax.f32 %v1472_v0, 0.0 }
 0x39a   : > { %v1479_v6 = vmax.f32 %v1475_v3, 0.0 }
 0x39c   : > { %v1480_v7 = vpack.c.bf16 %v1479_v6, %v1478_v5 }
 0x39e   : > { %1904 = vmatmul.mubr.msk.bf16.vlgmr.msra.gmra.mrb[12].mxu1 %vm1520_vm2, %v1480_v7 }
 0x471   : > { %v1558_v9 = vpop.f32.mrb[12].mxu1 }
 0x472   : > { %v1905_v10 = vpop.f32.mrb[13].mxu1  ;;  %v1559_v12 = vadd.f32 %v1818_v8, %v1558_v9 }
 0x473   : > { %v1561_v11 = vpop.f32.mrb[14].mxu1 }
 0x474   : > { %v1562_v13 = vadd.f32 %v1818_v8, %v1561_v11  ;;  %v1906_v14 = vpop.f32.mrb[15].mxu1 }
 0x476   : > { %v1837_v15 = vpack.c.bf16 %v1562_v13, %v1559_v12 }
 0x478   : > { %1838 = vst [vmem:[%s380_s25] sm:$0xff] %v1837_v15  }
 0x479   : > { %2278 = shalt.err (!%p2275_p2)
}
 0x47a   : > { %s2279_s17 = scalar_lea.hbm %s2673_s26, 128  ;;  %s2283_s23 = scalar_lea.hbm %s2726_s9, 256 }
 0x47b   : > { %p2280_p13 = scmp.ne.s32.totalorder %s2673_s26, %s2279_s17  ;;  %p2284_p4 = scmp.lt.u32.totalorder %s2673_s26, %s2726_s9 }
 0x47c   : > { %p2285_p7 = scmp.lt.u32.totalorder %s2283_s23, %s2279_s17  ;;  %p2287_p11 = scmp.lt.u32.totalorder %s2279_s17, %s2673_s26 }
 0x47d   : > { %p2281_p6 = pnand %p2280_p13, %p2746_p0 }
 0x47e   : > { %p2286_p8 = por %p2285_p7, %p2284_p4 }
 0x47f   : > { %p2282_p10 = pneg %p2281_p6 }
 0x480   : > { %p2288_p1 = por %p2287_p11, %p2286_p8 }
 0x482   : > { %p2289_p3 = pnand %p2288_p1, %p2282_p10 }
 0x484   : > { %2292 = shalt.err (!%p2289_p3)
}
 0x485   : > { %s2350_s1 = smov 64   ;;  %s2351_s3 = smov 4  }
 0x486   : > { %1936 = dma.vmem_to_hbm [thread:$0]  (%p2746_p0), %s2668_s29, 128, %s2673_s26, %s1576_s19, %s2350_s1, %s2350_s1, %s2351_s3  }
 0x487 PF: > { %s2747_s16 = sld [smem:[#allocation12_spill]]  ;;  %s1604_s13 = sand.u32 1, %s2323_s30  }
 0x488   : > { %p2749_p9 = scmp.ge.s32.totalorder %s2335_s12, 2  ;;  %s1605_s20 = scalar_lea.sflag [#allocation4], %s1604_s13 }
 0x48d   : > { %p2748_p5 = scmp.ne.s32.totalorder %s2747_s16, 0 }
 0x48f   : > { %p1950_p12 = pnand %p2749_p9, %p2748_p5 }
 0x491   : > { %2318 = dma.done.wait (!%p1950_p12), %s1605_s20, 128  }
 0x492   : > { %2320 = vsyncadd (!%p1950_p12), %s1605_s20, 4294967168  ;;  %p23_p2 = scmp.ge.s32.totalorder %s2512_s24, 4   ;;  %s2750_s30 = smov %s2327_s10 }
 0x493   : > { %s2751_s10 = smov %s2331_s11  ;;  %s2752_s11 = smov %s2521_s27 }
 0x494   : > { %s2753_s12 = smov %s2512_s24  ;;  %25 = sbr.rel (!%p23_p2) target bundleno = 9 (0x9), region = 109 }
 0x49b   :  { %1610 = vsyncpa [#allocation3], 1 }
 0x49c   :  { %1612 = vsyncpa [#allocation3 + $0x1], 1 }
 0x49d   :  { %1613 = vsyncpa [#allocation6], 1 }
 0x49e   :  { %1614 = vsyncpa [#allocation4], 1 }
 0x49f   :  { %1616 = vsyncpa [#allocation4 + $0x1], 1 }

</bundles_post_ra>
